<compile_context>
chip_gen: v7x
topology: tpu7x:2x2x1
jax: 0.10.0
libtpu: 0.0.40
codegen_flags: <defaults>
</compile_context>

<pallas_src>
import functools

import jax
import jax.numpy as jnp
import numpy as np
from jax import lax
from jax.experimental import pallas as pl
from jax.experimental.pallas import tpu as pltpu


def _round_up(x, m):
    return (x + m - 1) // m * m


def reward_head_kernel(last_ref, w_ref, b_ref, out_ref, *, use_mxu):
    """One batch-tile of the reward head.

    last_ref : (TB, H)  VMEM  bf16/f32  last-token hidden states
    w_ref    : (1, H)   VMEM  same dtype as hidden (bf16 path) / f32
    b_ref    : (1,)     SMEM  f32       gain-folded head bias (+ reward_bias)
    out_ref  : (TB, 1)  VMEM  f32
    """
    x = last_ref[...]
    w = w_ref[...]
    if use_mxu:
        # bf16 operands go straight into the MXU, f32 accumulation.
        # (TB, H) . (1, H)^T -> (TB, 1); same contraction pattern as q*k^T.
        r = lax.dot_general(
            x, w,
            dimension_numbers=(((1,), (1,)), ((), ())),
            preferred_element_type=jnp.float32)
    else:
        # f32 path: VPU multiply + XLU lane-reduce with f32 accumulation.
        # Exact, and stays hidden under the (2x larger) f32 DMA window.
        r = jnp.sum(x.astype(jnp.float32) * w.astype(jnp.float32),
                    axis=-1, keepdims=True)
    # Output is only B floats; the lane-width-1 store is off the critical path.
    out_ref[...] = r + b_ref[0]


def reward_head_forward(hidden_states, w_head, b_head, reward_gain, reward_bias):
    """Mirrors AutoModelForCausalLMWithRewardHead.forward.

    Returns (hidden_states, reward), analogous to (output, reward) in PyTorch
    (hidden_states standing in for the backbone output).
    """
    B, S, H = hidden_states.shape
    in_dtype = hidden_states.dtype
    in_bytes = jnp.dtype(in_dtype).itemsize

    # --- fold the affine (gain, bias) into the head params: one-time O(H) ---
    gain = reward_gain.astype(jnp.float32)
    w_f = (w_head.astype(jnp.float32).reshape(1, H) * gain)
    b_f = (gain * b_head.astype(jnp.float32)
           + reward_bias.astype(jnp.float32)).reshape(1)

    # Sub-32-bit hidden states (production bf16 case) use the MXU; keep the
    # weight in the same dtype so the operands feed the MXU directly.
    use_mxu = in_dtype != jnp.float32
    if use_mxu:
        w_f = w_f.astype(in_dtype)

    # --- batch tile size ---------------------------------------------------
    # Target >= 2 grid steps so the "parallel" axis can shard across v7x's
    # two TensorCores; cap so the 2-deep double-buffered (TB, H) input tile
    # stays within a VMEM budget valid on every chip generation.
    VMEM_INPUT_BUDGET = 24 * 1024 * 1024            # bytes for 2 x (TB, H)
    tb_cap = max(8, (VMEM_INPUT_BUDGET // (2 * H * in_bytes)) // 8 * 8)
    tb_target = _round_up(max(1, (B + 1) // 2), 8)  # ~half the batch per step
    TB = min(tb_target, tb_cap)
    if TB >= B:
        TB = B                                      # full dim: single step
    grid = (pl.cdiv(B, TB),)

    # Explicit scoped-VMEM limit: actual need is ~2*(TB*H*in + H*w + TB*4)
    # <= ~26 MiB by construction.  48 MiB raises v5e's 16 MiB scoped default
    # (keeps double buffering) and stays within v7x's 64 MiB physical VMEM.
    vmem_limit = 48 * 1024 * 1024

    if H % 128 == 0:
        # In-kernel last-token selection: view (B, S, H) as (B, S*H)
        # (metadata-only for a contiguous, unsharded backbone output) and let
        # the index_map fetch only block-column S-1 -> HBM reads are B*H.
        hidden_arg = hidden_states.reshape(B, S * H)
        hidden_spec = pl.BlockSpec((TB, H), lambda i: (i, S - 1))
    else:
        # TODO(synk): lane-unaligned H falls back to an XLA slice (one extra
        # B*H HBM read+write before the kernel); a 3-D BlockSpec / padded-H
        # variant would remove it, but this path is not the production case.
        hidden_arg = hidden_states[:, S - 1, :]
        hidden_spec = pl.BlockSpec((TB, H), lambda i: (i, 0))

    kernel = functools.partial(reward_head_kernel, use_mxu=use_mxu)

    reward = pl.pallas_call(
        kernel,
        out_shape=jax.ShapeDtypeStruct((B, 1), jnp.float32),
        grid=grid,
        in_specs=[
            hidden_spec,                                        # last-token rows
            pl.BlockSpec((1, H), lambda i: (0, 0)),             # folded weight
            pl.BlockSpec(memory_space=pltpu.MemorySpace.SMEM),  # folded bias
        ],
        out_specs=pl.BlockSpec((TB, 1), lambda i: (i, 0)),
        compiler_params=pltpu.CompilerParams(
            dimension_semantics=("parallel",),                  # megacore on v7x
            vmem_limit_bytes=vmem_limit),
    )(hidden_arg, w_f, b_f)

    return hidden_states, reward


def init_params(key, hidden_size):
    """Deterministic parameter init matching layer_init / __init__ semantics."""
    # scalar_head: nn.Linear(hidden_size, 1),
    #   weight ~ Normal(0, std = 1/sqrt(hidden_size + 1)), bias = 0
    std = 1.0 / jnp.sqrt(jnp.float32(hidden_size + 1))
    w_head = (jax.random.normal(key, (hidden_size, 1), dtype=jnp.float32) * std)
    b_head = jnp.zeros((1,), dtype=jnp.float32)
    reward_gain = jnp.ones((1,), dtype=jnp.float32)       # Parameter(1.0)
    reward_bias = jnp.zeros((1,), dtype=jnp.float32)      # Parameter(0.0)
    return w_head, b_head, reward_gain, reward_bias


def _reference(hidden_states, w_head, b_head, reward_gain, reward_bias):
    """float64 numpy reference (same semantics as the PyTorch forward)."""
    h = np.asarray(hidden_states).astype(np.float64)
    r = h[:, -1, :] @ np.asarray(w_head).astype(np.float64)
    r = r + np.asarray(b_head).astype(np.float64)
    return (np.asarray(reward_gain).astype(np.float64)[0] * r
            + np.asarray(reward_bias).astype(np.float64)[0])


if __name__ == "__main__":
    key = jax.random.PRNGKey(0)
    k_h1, k_w1, k_h2, k_w2, k_h3 = jax.random.split(key, 5)

    # --- path 1: f32, lane-aligned H (in-kernel last-token select, VPU dot) ---
    B, S, H = 8, 8, 128
    hidden_states = jax.random.normal(k_h1, (B, S, H), dtype=jnp.float32)
    w_head, b_head, reward_gain, reward_bias = init_params(k_w1, H)
    # Non-trivial gain/bias so the affine fold is actually exercised.
    reward_gain = jnp.array([1.25], dtype=jnp.float32)
    reward_bias = jnp.array([-0.5], dtype=jnp.float32)

    _, reward = reward_head_forward(hidden_states, w_head, b_head,
                                    reward_gain, reward_bias)
    reward = jax.block_until_ready(reward)
    ref = _reference(hidden_states, w_head, b_head, reward_gain, reward_bias)
    assert reward.shape == (B, 1)
    assert np.allclose(np.asarray(reward), ref, atol=1e-4, rtol=1e-4)

    # --- path 2: bf16, lane-aligned H, multi-step grid (MXU dot) ---
    B2, S2, H2 = 16, 8, 256
    hidden_bf16 = jax.random.normal(k_h2, (B2, S2, H2),
                                    dtype=jnp.float32).astype(jnp.bfloat16)
    w2, b2, g2, rb2 = init_params(k_w2, H2)
    g2 = jnp.array([0.75], dtype=jnp.float32)
    rb2 = jnp.array([0.25], dtype=jnp.float32)
    _, reward_bf16 = reward_head_forward(hidden_bf16, w2, b2, g2, rb2)
    reward_bf16 = jax.block_until_ready(reward_bf16)
    ref_bf16 = _reference(hidden_bf16, w2, b2, g2, rb2)
    assert reward_bf16.shape == (B2, 1)
    assert np.allclose(np.asarray(reward_bf16), ref_bf16, atol=2e-2, rtol=2e-2)

    # --- path 3: f32, H % 128 != 0 (wrapper-side last-token slice fallback) ---
    B3, S3, H3 = 2, 8, 32
    hidden3 = jax.random.normal(k_h3, (B3, S3, H3), dtype=jnp.float32)
    w3, b3, g3, rb3 = init_params(k_w1, H3)
    _, reward3 = reward_head_forward(hidden3, w3, b3, g3, rb3)
    reward3 = jax.block_until_ready(reward3)
    ref3 = _reference(hidden3, w3, b3, g3, rb3)
    assert reward3.shape == (B3, 1)
    assert np.allclose(np.asarray(reward3), ref3, atol=1e-4, rtol=1e-4)

    print("KERNEL_OK")
</pallas_src>

<mosaic_0001>
module attributes {stable_mosaic.version = 11 : i64} {
  func.func @reward_head_kernel(%arg0: i32, %arg1: memref<8x128xf32, #tpu.memory_space<vmem>>, %arg2: memref<1x128xf32, #tpu.memory_space<vmem>>, %arg3: memref<1xf32, #tpu.memory_space<smem>>, %arg4: memref<8x1xf32, #tpu.memory_space<vmem>>) attributes {dimension_semantics = [#tpu.dimension_semantics<parallel>], iteration_bounds = array<i64: 1>, scalar_prefetch = 0 : i64, scratch_operands = 0 : i64, tpu.core_type = #tpu.core_type<tc>, window_params = [{transform_indices = @transform_0, window_bounds = array<i64: 8, 128>}, {pipeline_mode = #tpu.pipeline_mode<synchronous>, transform_indices = @transform_1, window_bounds = array<i64: 1, 128>}, {transform_indices = @transform_2, window_bounds = array<i64: 1>}, {transform_indices = @transform_3, window_bounds = array<i64: 8, 1>}]} {
    %c0 = arith.constant 0 : index
    %c0_0 = arith.constant 0 : index
    %0 = vector.load %arg1[%c0, %c0_0] : memref<8x128xf32, #tpu.memory_space<vmem>>, vector<8x128xf32>
    %c0_1 = arith.constant 0 : index
    %c0_2 = arith.constant 0 : index
    %1 = vector.load %arg2[%c0_1, %c0_2] : memref<1x128xf32, #tpu.memory_space<vmem>>, vector<1x128xf32>
    %2 = vector.broadcast %1 : vector<1x128xf32> to vector<8x128xf32>
    %3 = arith.mulf %0, %2 : vector<8x128xf32>
    %cst = arith.constant dense<0.000000e+00> : vector<8xf32>
    %4 = vector.multi_reduction <add>, %3, %cst [1] : vector<8x128xf32> to vector<8xf32>
    %5 = vector.shape_cast %4 : vector<8xf32> to vector<8x1xf32>
    %c0_3 = arith.constant 0 : index
    %6 = memref.load %arg3[%c0_3] : memref<1xf32, #tpu.memory_space<smem>>
    %7 = vector.broadcast %6 : f32 to vector<8x1xf32>
    %8 = arith.addf %5, %7 : vector<8x1xf32>
    %c0_4 = arith.constant 0 : index
    %c0_5 = arith.constant 0 : index
    %9 = vector.load %arg4[%c0_4, %c0_5] : memref<8x1xf32, #tpu.memory_space<vmem>>, vector<8x1xf32>
    tpu.vector_store %arg4[%c0_4, %c0_5], %8 {strides = array<i32>} : memref<8x1xf32, #tpu.memory_space<vmem>>, vector<8x1xf32>,
    return
  }
  func.func @transform_0(%arg0: i32) -> (i32, i32) {
    %c7_i32 = arith.constant 7 : i32
    %c0_i32 = arith.constant 0 : i32
    return %arg0, %c7_i32 : i32, i32
  }
  func.func @transform_1(%arg0: i32) -> (i32, i32) {
    %c0_i32 = arith.constant 0 : i32
    %c0_i32_0 = arith.constant 0 : i32
    %c0_i32_1 = arith.constant 0 : i32
    return %c0_i32, %c0_i32_0 : i32, i32
  }
  func.func @transform_2(%arg0: i32) -> i32 {
    %c0_i32 = arith.constant 0 : i32
    %c0_i32_0 = arith.constant 0 : i32
    return %c0_i32 : i32
  }
  func.func @transform_3(%arg0: i32) -> (i32, i32) {
    %c0_i32 = arith.constant 0 : i32
    %c0_i32_0 = arith.constant 0 : i32
    return %arg0, %c0_i32 : i32, i32
  }
}

</mosaic_0001>

<bundles_post_ra>
// kernel: tpu_custom_call.1
= control target key start
LH: loop header
LB: loop body
LE: loop exit
PB: predicated region body
PF: predicated region fallthrough
CT: control target
= control target key end

     0   :  { %9 = vsyncpa [#allocation4], 0  ;;  %s78_s15 = smov [#allocation3]   ;;  %s117_s0 = inlined_call_operand.hbm [shape: f32[8,1024], index: 0, kind: input, shape index: {}]   ;;  %s118_s1 = inlined_call_operand.vmem [shape: f32[1,128], index: 1, kind: input, shape index: {}]   ;;  %s119_s2 = inlined_call_operand.<no memory space> [shape: f32[1], index: 2, kind: input, shape index: {}]   ;;  %s120_s3 = inlined_call_operand.vmem [shape: f32[8,1], index: 3, kind: output, shape index: {}]  }
   0x1   :  { %s15_s14 = scalar_lea.hbm %s117_s0, 896  ;;  %s17_s16 = sshll.u32 %s78_s15, 4  ;;  %s18_s16 = int_to_ptr.vmem [resolvable:$true] %s17_s16 }
   0x2   :  { %s75_s19 = scalar_lea.hbm %s117_s0, 1024  ;;  %p54_p1 = scmp.lt.u32.totalorder %s15_s14, %s117_s0 }
   0x3   :  { %p52_p0 = scmp.ne.s32.totalorder %s15_s14, %s75_s19  ;;  %p55_p2 = scmp.lt.u32.totalorder %s75_s19, %s75_s19 }
   0x4   :  { %p57_p4 = scmp.lt.u32.totalorder %s75_s19, %s15_s14 }
   0x5   :  { %p56_p3 = por %p55_p2, %p54_p1 }
   0x7   :  { %p58_p5 = por %p57_p4, %p56_p3 }
   0x9   :  { %p59_p6 = pnand %p58_p5, %p52_p0 }
   0xb   :  { %62 = shalt.err (!%p59_p6)
}
   0xc   :  { %s63_s22 = scalar_lea.vmem %s18_s16, 128  ;;  %p68_p8 = scmp.lt.s32.totalorder %s18_s16, %s18_s16 }
   0xd   :  { %p64_p7 = scmp.ne.s32.totalorder %s18_s16, %s63_s22  ;;  %p69_p9 = scmp.lt.s32.totalorder %s63_s22, %s63_s22 }
   0xf   :  { %p70_p10 = por %p69_p9, %p68_p8 }
  0x11   :  { %p71_p11 = pnand %p70_p10, %p64_p7 }
  0x13   :  { %74 = shalt.err (!%p71_p11)
}
  0x14   :  { %20 = dma.hbm_to_vmem [thread:$0]  %s15_s14, 128, %s18_s16, [#allocation4]  }
  0x15   :  { %76 = dma.done.wait [#allocation4], 128  }
  0x16   :  { %77 = vsyncadd [#allocation4], 4294967168  ;;  %v28_v0 = vld [vmem:[#allocation3] sm:$0xff]  ;;  %v40_v3 = vstv %s119_s2  ;;  %vm42_vm0 = vcmask 7168  }
  0x17   :  { %v49_v1 = vld [vmem:[%s118_s1] ss:$0 sm:$0xff] }
  0x18   :  { %v36_v2 = vmul.f32 %v49_v1, %v28_v0 }
  0x1a   :  { %37 = vadd.xlane.f32.xlu0 %v36_v2 }
  0xa7   :  { %v38_v4 = vpop.xlane.xlu0 %37 }
  0xa8   :  { %v41_v5 = vadd.f32 %v40_v3, %v38_v4 }
  0xaa   :  { %43 = vst.msk [vmem:[%s120_s3] sm:$0xff] %vm42_vm0, %v41_v5 }
  0xab   :  { %48 = vsyncpa [#allocation4], 1 }

</bundles_post_ra>
